<compile_context>
chip_gen: v7x
topology: tpu7x:2x2x1
jax: 0.10.0
libtpu: 0.0.40
codegen_flags: <defaults>
</compile_context>

<pallas_src>
import jax
import jax.numpy as jnp
from jax.experimental import pallas as pl
from jax.experimental.pallas import tpu as pltpu


_NUM_LAYERS = 6
_RELU_LAYERS = (0, 1, 3, 4)   # layers followed by ReLU; layer 2 is linear, layer 5 -> sigmoid
_TB_CAP = 2048                # max batch-tile rows (VMEM use stays far below limits)
_TARGET_STEPS = 8             # aim for >=8 grid steps (v7x megacore + pipelining)


def _round_up(n, m):
    return (n + m - 1) // m * m


def _pick_batch_tile(B):
    """Batch tile: multiple of 16 (bf16 sublanes), capped at _TB_CAP, aiming for
    ~_TARGET_STEPS grid steps.  For tiny batches use a single full-extent block
    (a block dim equal to the full array dim is always legal)."""
    tb = min(_TB_CAP, max(16, _round_up(pl.cdiv(B, _TARGET_STEPS), 16)))
    if tb >= B:
        tb = B
    return tb


def _autoencoder_kernel(x_ref, w_ref, b_ref, o_ref):
    """Fused 6-layer MLP forward on one batch tile.

    x_ref: [TB, P] f32 or bf16  (features; zero weight rows handle any feature pad)
    w_ref: [6, P, P] bf16       (zero-padded weight slab, y = x @ W)
    b_ref: [6, 1, P] f32        (zero-padded bias slab)
    o_ref: [TB, P] bf16
    """
    h = x_ref[...].astype(jnp.bfloat16)           # feed MXU in bf16
    for l in range(_NUM_LAYERS):
        acc = jnp.dot(h, w_ref[l], preferred_element_type=jnp.float32)
        acc = acc + b_ref[l]
        if l in _RELU_LAYERS:
            acc = jnp.maximum(acc, 0.0)
        elif l == _NUM_LAYERS - 1:
            # sigmoid(x) = 1 / (1 + exp(-x)) with exp + reciprocal on the EUP slot.
            acc = pl.reciprocal(1.0 + jnp.exp(-acc), approx=True)
        if l < _NUM_LAYERS - 1:
            h = acc.astype(jnp.bfloat16)
        else:
            o_ref[...] = acc.astype(o_ref.dtype)


@jax.jit
def autoencoder_forward(x, w_slab, b_slab):
    """x: [B, input_size] (f32 or bf16); w_slab: [6, P, P] bf16; b_slab: [6, 1, P] f32.

    Returns [B, input_size] bf16.
    """
    B, input_size = x.shape
    P = w_slab.shape[-1]

    # Fast path: input already lane-dense -> no wrapper pad / slice HBM passes.
    lane_dense = (input_size == P)
    x_in = x if lane_dense else jnp.pad(x, ((0, 0), (0, P - input_size)))

    TB = _pick_batch_tile(B)
    grid = (pl.cdiv(B, TB),)   # ragged tail handled by Pallas block masking

    out = pl.pallas_call(
        _autoencoder_kernel,
        out_shape=jax.ShapeDtypeStruct((B, P), jnp.bfloat16),
        grid=grid,
        in_specs=[
            pl.BlockSpec((TB, P), lambda i: (i, 0)),          # x tile, pipelined
            pl.BlockSpec((_NUM_LAYERS, P, P), lambda i: (0, 0, 0)),   # weights, resident
            pl.BlockSpec((_NUM_LAYERS, 1, P), lambda i: (0, 0, 0)),   # biases, resident
        ],
        out_specs=pl.BlockSpec((TB, P), lambda i: (i, 0)),
        compiler_params=pltpu.CompilerParams(
            dimension_semantics=("parallel",)),
    )(x_in, w_slab, b_slab)

    return out if lane_dense else out[:, :input_size]


def init_params(key, input_size):
    """Deterministic init matching nn.Linear shapes (Kaiming-uniform-like bounds).

    Returns list of (W, b) with W [in, out] (transpose of torch's [out, in]), b [1, out].
    """
    dims = [(input_size, 64), (64, 32), (32, 16),
            (16, 32), (32, 64), (64, input_size)]
    params = []
    for fan_in, fan_out in dims:
        key, kw, kb = jax.random.split(key, 3)
        bound = 1.0 / jnp.sqrt(fan_in)
        w = jax.random.uniform(kw, (fan_in, fan_out), jnp.float32, -bound, bound)
        b = jax.random.uniform(kb, (1, fan_out), jnp.float32, -bound, bound)
        params.append((w, b))
    return params


def pack_params(params, input_size):
    """Zero-pad the 6 layers into one bf16 weight slab + one f32 bias slab."""
    P = max(128, _round_up(input_size, 128))
    w_slab = jnp.zeros((_NUM_LAYERS, P, P), jnp.bfloat16)
    b_slab = jnp.zeros((_NUM_LAYERS, 1, P), jnp.float32)
    for l, (w, b) in enumerate(params):
        fi, fo = w.shape
        w_slab = w_slab.at[l, :fi, :fo].set(w.astype(jnp.bfloat16))
        b_slab = b_slab.at[l, :1, :fo].set(b.astype(jnp.float32))
    return w_slab, b_slab


def reference_forward_f32(x, params):
    """Pure-f32 JAX reference (original module semantics)."""
    h = x
    h = jnp.maximum(h @ params[0][0] + params[0][1], 0.0)
    h = jnp.maximum(h @ params[1][0] + params[1][1], 0.0)
    h = h @ params[2][0] + params[2][1]
    h = jnp.maximum(h @ params[3][0] + params[3][1], 0.0)
    h = jnp.maximum(h @ params[4][0] + params[4][1], 0.0)
    return jax.nn.sigmoid(h @ params[5][0] + params[5][1])


def reference_forward_bf16(x, w_slab, b_slab, input_size):
    """Reference mirroring the kernel's bf16-storage / f32-accumulate math."""
    P = w_slab.shape[-1]
    h = jnp.pad(x, ((0, 0), (0, P - input_size))).astype(jnp.bfloat16)
    for l in range(_NUM_LAYERS):
        acc = jnp.dot(h, w_slab[l], preferred_element_type=jnp.float32) + b_slab[l]
        if l in _RELU_LAYERS:
            acc = jnp.maximum(acc, 0.0)
        elif l == _NUM_LAYERS - 1:
            acc = jax.nn.sigmoid(acc)
        h = acc.astype(jnp.bfloat16)
    return h.astype(jnp.float32)[:, :input_size]


if __name__ == "__main__":
    input_size = 128

    key = jax.random.PRNGKey(0)
    key, kx_small, kx_ragged = jax.random.split(key, 3)
    params = init_params(key, input_size)
    w_slab, b_slab = pack_params(params, input_size)

    # batch=8  -> single full-extent block (tiny-batch path)
    # batch=72 -> multi-step grid with a ragged (half-valid) last block
    test_cases = [(8, kx_small), (72, kx_ragged)]
    for batch, kx in test_cases:
        x = jax.random.normal(kx, (batch, input_size), jnp.float32)

        out = jax.block_until_ready(autoencoder_forward(x, w_slab, b_slab))
        assert out.shape == (batch, input_size)
        assert out.dtype == jnp.bfloat16
        out_f32 = out.astype(jnp.float32)

        ref_mirror = reference_forward_bf16(x, w_slab, b_slab, input_size)
        assert jnp.allclose(out_f32, ref_mirror, atol=1e-2, rtol=1e-2), \
            f"mismatch vs bf16-mirrored reference (batch={batch})"

        ref_f32 = reference_forward_f32(x, params)
        assert jnp.allclose(out_f32, ref_f32, atol=5e-2, rtol=5e-2), \
            f"mismatch vs f32 reference (batch={batch})"

    print("KERNEL_OK")
</pallas_src>

<mosaic_0001>
module attributes {stable_mosaic.version = 11 : i64} {
  func.func @_autoencoder_kernel(%arg0: i32, %arg1: memref<8x128xf32, #tpu.memory_space<vmem>>, %arg2: memref<6x128x128xbf16, #tpu.memory_space<vmem>>, %arg3: memref<6x1x128xf32, #tpu.memory_space<vmem>>, %arg4: memref<8x128xbf16, #tpu.memory_space<vmem>>) attributes {dimension_semantics = [#tpu.dimension_semantics<parallel>], iteration_bounds = array<i64: 1>, scalar_prefetch = 0 : i64, scratch_operands = 0 : i64, tpu.core_type = #tpu.core_type<tc>, window_params = [{transform_indices = @transform_0, window_bounds = array<i64: 8, 128>}, {pipeline_mode = #tpu.pipeline_mode<synchronous>, transform_indices = @transform_1, window_bounds = array<i64: 6, 128, 128>}, {pipeline_mode = #tpu.pipeline_mode<synchronous>, transform_indices = @transform_2, window_bounds = array<i64: 6, 1, 128>}, {transform_indices = @transform_3, window_bounds = array<i64: 8, 128>}]} {
    %c0 = arith.constant 0 : index
    %c0_0 = arith.constant 0 : index
    %0 = vector.load %arg1[%c0, %c0_0] : memref<8x128xf32, #tpu.memory_space<vmem>>, vector<8x128xf32>
    %1 = arith.truncf %0 : vector<8x128xf32> to vector<8x128xbf16>
    %c0_1 = arith.constant 0 : index
    %c0_2 = arith.constant 0 : index
    %c0_3 = arith.constant 0 : index
    %2 = vector.load %arg2[%c0_1, %c0_2, %c0_3] : memref<6x128x128xbf16, #tpu.memory_space<vmem>>, vector<1x128x128xbf16>
    %3 = vector.shape_cast %2 : vector<1x128x128xbf16> to vector<128x128xbf16>
    %cst = arith.constant dense<0.000000e+00> : vector<8x128xf32>
    %4 = tpu.matmul %1, %3, %cst {dimension_numbers = #tpu.dot_dimension_numbers<[1], [0], [0], [1], [0, 0, 1, 1], [], []>} : vector<8x128xbf16>, vector<128x128xbf16>, vector<8x128xf32> -> vector<8x128xf32>
    %c0_4 = arith.constant 0 : index
    %c0_5 = arith.constant 0 : index
    %c0_6 = arith.constant 0 : index
    %5 = vector.load %arg3[%c0_4, %c0_5, %c0_6] : memref<6x1x128xf32, #tpu.memory_space<vmem>>, vector<1x1x128xf32>
    %6 = vector.shape_cast %5 : vector<1x1x128xf32> to vector<1x128xf32>
    %7 = vector.broadcast %6 : vector<1x128xf32> to vector<8x128xf32>
    %8 = arith.addf %4, %7 : vector<8x128xf32>
    %cst_7 = arith.constant 0.000000e+00 : f32
    %9 = vector.broadcast %cst_7 : f32 to vector<8x128xf32>
    %10 = arith.maximumf %8, %9 : vector<8x128xf32>
    %11 = arith.truncf %10 : vector<8x128xf32> to vector<8x128xbf16>
    %c1 = arith.constant 1 : index
    %c0_8 = arith.constant 0 : index
    %c0_9 = arith.constant 0 : index
    %12 = vector.load %arg2[%c1, %c0_8, %c0_9] : memref<6x128x128xbf16, #tpu.memory_space<vmem>>, vector<1x128x128xbf16>
    %13 = vector.shape_cast %12 : vector<1x128x128xbf16> to vector<128x128xbf16>
    %cst_10 = arith.constant dense<0.000000e+00> : vector<8x128xf32>
    %14 = tpu.matmul %11, %13, %cst_10 {dimension_numbers = #tpu.dot_dimension_numbers<[1], [0], [0], [1], [0, 0, 1, 1], [], []>} : vector<8x128xbf16>, vector<128x128xbf16>, vector<8x128xf32> -> vector<8x128xf32>
    %c1_11 = arith.constant 1 : index
    %c0_12 = arith.constant 0 : index
    %c0_13 = arith.constant 0 : index
    %15 = vector.load %arg3[%c1_11, %c0_12, %c0_13] : memref<6x1x128xf32, #tpu.memory_space<vmem>>, vector<1x1x128xf32>
    %16 = vector.shape_cast %15 : vector<1x1x128xf32> to vector<1x128xf32>
    %17 = vector.broadcast %16 : vector<1x128xf32> to vector<8x128xf32>
    %18 = arith.addf %14, %17 : vector<8x128xf32>
    %cst_14 = arith.constant 0.000000e+00 : f32
    %19 = vector.broadcast %cst_14 : f32 to vector<8x128xf32>
    %20 = arith.maximumf %18, %19 : vector<8x128xf32>
    %21 = arith.truncf %20 : vector<8x128xf32> to vector<8x128xbf16>
    %c2 = arith.constant 2 : index
    %c0_15 = arith.constant 0 : index
    %c0_16 = arith.constant 0 : index
    %22 = vector.load %arg2[%c2, %c0_15, %c0_16] : memref<6x128x128xbf16, #tpu.memory_space<vmem>>, vector<1x128x128xbf16>
    %23 = vector.shape_cast %22 : vector<1x128x128xbf16> to vector<128x128xbf16>
    %cst_17 = arith.constant dense<0.000000e+00> : vector<8x128xf32>
    %24 = tpu.matmul %21, %23, %cst_17 {dimension_numbers = #tpu.dot_dimension_numbers<[1], [0], [0], [1], [0, 0, 1, 1], [], []>} : vector<8x128xbf16>, vector<128x128xbf16>, vector<8x128xf32> -> vector<8x128xf32>
    %c2_18 = arith.constant 2 : index
    %c0_19 = arith.constant 0 : index
    %c0_20 = arith.constant 0 : index
    %25 = vector.load %arg3[%c2_18, %c0_19, %c0_20] : memref<6x1x128xf32, #tpu.memory_space<vmem>>, vector<1x1x128xf32>
    %26 = vector.shape_cast %25 : vector<1x1x128xf32> to vector<1x128xf32>
    %27 = vector.broadcast %26 : vector<1x128xf32> to vector<8x128xf32>
    %28 = arith.addf %24, %27 : vector<8x128xf32>
    %29 = arith.truncf %28 : vector<8x128xf32> to vector<8x128xbf16>
    %c3 = arith.constant 3 : index
    %c0_21 = arith.constant 0 : index
    %c0_22 = arith.constant 0 : index
    %30 = vector.load %arg2[%c3, %c0_21, %c0_22] : memref<6x128x128xbf16, #tpu.memory_space<vmem>>, vector<1x128x128xbf16>
    %31 = vector.shape_cast %30 : vector<1x128x128xbf16> to vector<128x128xbf16>
    %cst_23 = arith.constant dense<0.000000e+00> : vector<8x128xf32>
    %32 = tpu.matmul %29, %31, %cst_23 {dimension_numbers = #tpu.dot_dimension_numbers<[1], [0], [0], [1], [0, 0, 1, 1], [], []>} : vector<8x128xbf16>, vector<128x128xbf16>, vector<8x128xf32> -> vector<8x128xf32>
    %c3_24 = arith.constant 3 : index
    %c0_25 = arith.constant 0 : index
    %c0_26 = arith.constant 0 : index
    %33 = vector.load %arg3[%c3_24, %c0_25, %c0_26] : memref<6x1x128xf32, #tpu.memory_space<vmem>>, vector<1x1x128xf32>
    %34 = vector.shape_cast %33 : vector<1x1x128xf32> to vector<1x128xf32>
    %35 = vector.broadcast %34 : vector<1x128xf32> to vector<8x128xf32>
    %36 = arith.addf %32, %35 : vector<8x128xf32>
    %cst_27 = arith.constant 0.000000e+00 : f32
    %37 = vector.broadcast %cst_27 : f32 to vector<8x128xf32>
    %38 = arith.maximumf %36, %37 : vector<8x128xf32>
    %39 = arith.truncf %38 : vector<8x128xf32> to vector<8x128xbf16>
    %c4 = arith.constant 4 : index
    %c0_28 = arith.constant 0 : index
    %c0_29 = arith.constant 0 : index
    %40 = vector.load %arg2[%c4, %c0_28, %c0_29] : memref<6x128x128xbf16, #tpu.memory_space<vmem>>, vector<1x128x128xbf16>
    %41 = vector.shape_cast %40 : vector<1x128x128xbf16> to vector<128x128xbf16>
    %cst_30 = arith.constant dense<0.000000e+00> : vector<8x128xf32>
    %42 = tpu.matmul %39, %41, %cst_30 {dimension_numbers = #tpu.dot_dimension_numbers<[1], [0], [0], [1], [0, 0, 1, 1], [], []>} : vector<8x128xbf16>, vector<128x128xbf16>, vector<8x128xf32> -> vector<8x128xf32>
    %c4_31 = arith.constant 4 : index
    %c0_32 = arith.constant 0 : index
    %c0_33 = arith.constant 0 : index
    %43 = vector.load %arg3[%c4_31, %c0_32, %c0_33] : memref<6x1x128xf32, #tpu.memory_space<vmem>>, vector<1x1x128xf32>
    %44 = vector.shape_cast %43 : vector<1x1x128xf32> to vector<1x128xf32>
    %45 = vector.broadcast %44 : vector<1x128xf32> to vector<8x128xf32>
    %46 = arith.addf %42, %45 : vector<8x128xf32>
    %cst_34 = arith.constant 0.000000e+00 : f32
    %47 = vector.broadcast %cst_34 : f32 to vector<8x128xf32>
    %48 = arith.maximumf %46, %47 : vector<8x128xf32>
    %49 = arith.truncf %48 : vector<8x128xf32> to vector<8x128xbf16>
    %c5 = arith.constant 5 : index
    %c0_35 = arith.constant 0 : index
    %c0_36 = arith.constant 0 : index
    %50 = vector.load %arg2[%c5, %c0_35, %c0_36] : memref<6x128x128xbf16, #tpu.memory_space<vmem>>, vector<1x128x128xbf16>
    %51 = vector.shape_cast %50 : vector<1x128x128xbf16> to vector<128x128xbf16>
    %cst_37 = arith.constant dense<0.000000e+00> : vector<8x128xf32>
    %52 = tpu.matmul %49, %51, %cst_37 {dimension_numbers = #tpu.dot_dimension_numbers<[1], [0], [0], [1], [0, 0, 1, 1], [], []>} : vector<8x128xbf16>, vector<128x128xbf16>, vector<8x128xf32> -> vector<8x128xf32>
    %c5_38 = arith.constant 5 : index
    %c0_39 = arith.constant 0 : index
    %c0_40 = arith.constant 0 : index
    %53 = vector.load %arg3[%c5_38, %c0_39, %c0_40] : memref<6x1x128xf32, #tpu.memory_space<vmem>>, vector<1x1x128xf32>
    %54 = vector.shape_cast %53 : vector<1x1x128xf32> to vector<1x128xf32>
    %55 = vector.broadcast %54 : vector<1x128xf32> to vector<8x128xf32>
    %56 = arith.addf %52, %55 : vector<8x128xf32>
    %cst_41 = arith.constant 0.000000e+00 : f32
    %57 = vector.broadcast %cst_41 : f32 to vector<8x128xf32>
    %58 = arith.subf %57, %56 : vector<8x128xf32>
    %59 = math.exp %58 : vector<8x128xf32>
    %cst_42 = arith.constant 1.000000e+00 : f32
    %60 = vector.broadcast %cst_42 : f32 to vector<8x128xf32>
    %61 = arith.addf %60, %59 : vector<8x128xf32>
    %62 = tpu.reciprocal %61 {approx = true} : vector<8x128xf32> -> vector<8x128xf32>
    %63 = arith.truncf %62 : vector<8x128xf32> to vector<8x128xbf16>
    %c0_43 = arith.constant 0 : index
    %c0_44 = arith.constant 0 : index
    %64 = vector.load %arg4[%c0_43, %c0_44] : memref<8x128xbf16, #tpu.memory_space<vmem>>, vector<8x128xbf16>
    tpu.vector_store %arg4[%c0_43, %c0_44], %63 {strides = array<i32>} : memref<8x128xbf16, #tpu.memory_space<vmem>>, vector<8x128xbf16>,
    return
  }
  func.func @transform_0(%arg0: i32) -> (i32, i32) {
    %c0_i32 = arith.constant 0 : i32
    %c0_i32_0 = arith.constant 0 : i32
    return %arg0, %c0_i32 : i32, i32
  }
  func.func @transform_1(%arg0: i32) -> (i32, i32, i32) {
    %c0_i32 = arith.constant 0 : i32
    %c0_i32_0 = arith.constant 0 : i32
    %c0_i32_1 = arith.constant 0 : i32
    %c0_i32_2 = arith.constant 0 : i32
    return %c0_i32, %c0_i32_0, %c0_i32_1 : i32, i32, i32
  }
  func.func @transform_2(%arg0: i32) -> (i32, i32, i32) {
    %c0_i32 = arith.constant 0 : i32
    %c0_i32_0 = arith.constant 0 : i32
    %c0_i32_1 = arith.constant 0 : i32
    %c0_i32_2 = arith.constant 0 : i32
    return %c0_i32, %c0_i32_0, %c0_i32_1 : i32, i32, i32
  }
  func.func @transform_3(%arg0: i32) -> (i32, i32) {
    %c0_i32 = arith.constant 0 : i32
    %c0_i32_0 = arith.constant 0 : i32
    return %arg0, %c0_i32 : i32, i32
  }
}

</mosaic_0001>

<bundles_post_ra>
// kernel: autoencoder_forward.1
= control target key start
LH: loop header
LB: loop body
LE: loop exit
PB: predicated region body
PF: predicated region fallthrough
CT: control target
= control target key end

     0   :  { %8 = vsyncpa [#allocation3], 0  ;;  %s1264_s0 = inlined_call_operand.hbm [shape: f32[8,128], index: 0, kind: input, shape index: {}]   ;;  %s1265_s1 = inlined_call_operand.hbm [shape: bf16[6,128,128], index: 1, kind: input, shape index: {}]   ;;  %s1266_s2 = inlined_call_operand.vmem [shape: f32[6,1,128], index: 2, kind: input, shape index: {}]   ;;  %s1267_s3 = inlined_call_operand.hbm [shape: bf16[8,128], index: 3, kind: output, shape index: {}]  }
   0x1   :  { %9 = vsyncpa [#allocation6], 0 }
   0x2   :  { %10 = vsyncpa [#allocation4], 0  ;;  %s1116_s12 = smov [#allocation2]   ;;  %s1117_s14 = smov [#allocation5]  }
   0x3   :  { %s17_s13 = sshll.u32 %s1116_s12, 4  ;;  %s26_s15 = sshll.u32 %s1117_s14, 4  ;;  %s18_s13 = int_to_ptr.vmem [resolvable:$true] %s17_s13  ;;  %s1143_s15 = int_to_ptr.vmem [resolvable:$true] %s26_s15 }
   0x4   :  { %s1044_s18 = scalar_lea.hbm %s1264_s0, 128 }
   0x5   :  { %p1045_p0 = scmp.ne.s32.totalorder %s1264_s0, %s1044_s18  ;;  %p1048_p1 = scmp.lt.u32.totalorder %s1044_s18, %s1264_s0 }
   0x7   :  { %p1050_p2 = pnand %p1048_p1, %p1045_p0 }
   0x9   :  { %1053 = shalt.err (!%p1050_p2)
}
   0xa   :  { %s1054_s23 = scalar_lea.vmem %s18_s13, 128  ;;  %p1059_p4 = scmp.lt.s32.totalorder %s18_s13, %s18_s13 }
   0xb   :  { %p1055_p3 = scmp.ne.s32.totalorder %s18_s13, %s1054_s23  ;;  %p1060_p5 = scmp.lt.s32.totalorder %s1054_s23, %s1054_s23 }
   0xd   :  { %p1061_p6 = por %p1060_p5, %p1059_p4 }
   0xf   :  { %p1062_p7 = pnand %p1061_p6, %p1055_p3 }
  0x11   :  { %1065 = shalt.err (!%p1062_p7)
}
  0x12   :  { %20 = dma.hbm_to_vmem [thread:$0]  %s1264_s0, 128, %s18_s13, [#allocation3]  }
  0x13   :  { %s1066_s28 = scalar_lea.hbm %s1265_s1, 6144 }
  0x14   :  { %p1067_p8 = scmp.ne.s32.totalorder %s1265_s1, %s1066_s28  ;;  %p1070_p9 = scmp.lt.u32.totalorder %s1066_s28, %s1265_s1 }
  0x16   :  { %p1072_p10 = pnand %p1070_p9, %p1067_p8 }
  0x18   :  { %1075 = shalt.err (!%p1072_p10)
}
  0x19   :  { %s1076_s6 = scalar_lea.vmem %s1143_s15, 6144  ;;  %p1081_p12 = scmp.lt.s32.totalorder %s1143_s15, %s1143_s15 }
  0x1a   :  { %p1077_p11 = scmp.ne.s32.totalorder %s1143_s15, %s1076_s6  ;;  %p1082_p13 = scmp.lt.s32.totalorder %s1076_s6, %s1076_s6 }
  0x1c   :  { %p1083_p0 = por %p1082_p13, %p1081_p12 }
  0x1e   :  { %p1084_p1 = pnand %p1083_p0, %p1077_p11 }
  0x20   :  { %1087 = shalt.err (!%p1084_p1)
}
  0x21   :  { %s1118_s0 = smov 64   ;;  %s1119_s7 = smov 4  }
  0x22   :  { %32 = dma.hbm_to_vmem [thread:$0]  %s1265_s1, 6144, %s1143_s15, [#allocation6], %s1118_s0, %s1118_s0, %s1119_s7  }
  0x23   :  { %1110 = dma.done.wait [#allocation3], 128  }
  0x24   :  { %1111 = vsyncadd [#allocation3], 4294967168 }
  0x25   :  { %1112 = dma.done.wait [#allocation6], 6144  }
  0x26   :  { %1113 = vsyncadd [#allocation6], 4294961152  ;;  %v1120_v0 = vmov 0.0   ;;  %vm1121_vm0 = vmmov 0   ;;  %v992_v1 = vld [vmem:[#allocation5] sm:$0xff]   ;;  %v993_v2 = vld [vmem:[#allocation5 + $0x8] sm:$0xff]  }
  0x27   :  { %865 = vmatprep.subr.bf16.mxu0 %v1120_v0  ;;  %881 = vmatprep.mubr.msk.bf16.mxu0 %vm1121_vm0, %v1120_v0  ;;  %v994_v3 = vld [vmem:[#allocation5 + $0x10] sm:$0xff]   ;;  %v1000_v4 = vld [vmem:[#allocation5 + $0x40] sm:$0xff]   ;;  %v995_v5 = vld [vmem:[#allocation5 + $0x18] sm:$0xff]   ;;  %s1122_s21 = smov [#allocation7]  }
  0x28   :  { %885 = vmatprep.subr.bf16.mxu1 %v1120_v0  ;;  %901 = vmatprep.mubr.msk.bf16.mxu1 %vm1121_vm0, %v1120_v0  ;;  %v1001_v6 = vld [vmem:[#allocation5 + $0x48] sm:$0xff]   ;;  %v996_v7 = vld [vmem:[#allocation5 + $0x20] sm:$0xff]   ;;  %v1002_v8 = vld [vmem:[#allocation5 + $0x50] sm:$0xff]   ;;  %s742_s22 = sshll.u32 %s1122_s21, 4  ;;  %s743_s22 = int_to_ptr.vmem [resolvable:$true] %s742_s22 }
  0x29   :  { %866 = vmatpush3.bf16.msra.mxu0 %v992_v1  ;;  %886 = vmatpush3.bf16.msra.mxu1 %v1000_v4  ;;  %v997_v9 = vld [vmem:[#allocation5 + $0x28] sm:$0xff]   ;;  %v1003_v10 = vld [vmem:[#allocation5 + $0x58] sm:$0xff]   ;;  %v998_v11 = vld [vmem:[#allocation5 + $0x30] sm:$0xff]   ;;  %s1088_s23 = scalar_lea.vmem %s743_s22, 64  ;;  %p1093_p3 = scmp.lt.s32.totalorder %s743_s22, %s743_s22 }
  0x2a   :  { %867 = vmatprep.subr.bf16.mxu0 %v1120_v0  ;;  %887 = vmatprep.subr.bf16.mxu1 %v1120_v0  ;;  %v1004_v12 = vld [vmem:[#allocation5 + $0x60] sm:$0xff]   ;;  %v999_v13 = vld [vmem:[#allocation5 + $0x38] sm:$0xff]   ;;  %v1005_v15 = vld [vmem:[#allocation5 + $0x68] sm:$0xff]   ;;  %p1089_p2 = scmp.ne.s32.totalorder %s743_s22, %s1088_s23  ;;  %p1094_p4 = scmp.lt.s32.totalorder %s1088_s23, %s1088_s23 }
  0x2b   :  { %v42_v14 = vld [vmem:[#allocation2] sm:$0xff]  ;;  %v1006_v17 = vld [vmem:[#allocation5 + $0x70] sm:$0xff]   ;;  %v1008_v19 = vld [vmem:[#allocation5 + $0x80] sm:$0xff]  }
  0x2c   :  { %v43_v16 = vpack.c.bf16 %v42_v14, %v42_v14  ;;  %v1007_v18 = vld [vmem:[#allocation5 + $0x78] sm:$0xff]   ;;  %v1009_v20 = vld [vmem:[#allocation5 + $0x88] sm:$0xff]   ;;  %v1010_v21 = vld [vmem:[#allocation5 + $0x90] sm:$0xff]   ;;  %p1095_p5 = por %p1094_p4, %p1093_p3 }
  0x2d   :  { %868 = vmatpush3.bf16.msra.mxu0 %v993_v2  ;;  %888 = vmatpush3.bf16.msra.mxu1 %v1001_v6  ;;  %v1011_v22 = vld [vmem:[#allocation5 + $0x98] sm:$0xff]   ;;  %v1012_v23 = vld [vmem:[#allocation5 + $0xa0] sm:$0xff]   ;;  %v1013_v24 = vld [vmem:[#allocation5 + $0xa8] sm:$0xff]  }
  0x2e   :  { %869 = vmatprep.subr.bf16.mxu0 %v1120_v0  ;;  %889 = vmatprep.subr.bf16.mxu1 %v1120_v0  ;;  %v752_v25 = vld [vmem:[%s1266_s2] ss:$0 sm:$0xff]  ;;  %v1014_v33 = vld [vmem:[#allocation5 + $0xb0] sm:$0xff]   ;;  %v1016_v35 = vld [vmem:[#allocation5 + $0xc0] sm:$0xff]   ;;  %p1096_p6 = pnand %p1095_p5, %p1089_p2 }
  0x2f   :  { %v1015_v34 = vld [vmem:[#allocation5 + $0xb8] sm:$0xff]   ;;  %v1017_v36 = vld [vmem:[#allocation5 + $0xc8] sm:$0xff]   ;;  %v1018_v37 = vld [vmem:[#allocation5 + $0xd0] sm:$0xff]  }
  0x30   :  { %v1019_v38 = vld [vmem:[#allocation5 + $0xd8] sm:$0xff]   ;;  %v1020_v39 = vld [vmem:[#allocation5 + $0xe0] sm:$0xff]   ;;  %v1021_v40 = vld [vmem:[#allocation5 + $0xe8] sm:$0xff]  }
  0x31   :  { %870 = vmatpush3.bf16.msra.mxu0 %v994_v3  ;;  %890 = vmatpush3.bf16.msra.mxu1 %v1002_v8  ;;  %v1022_v41 = vld [vmem:[#allocation5 + $0xf0] sm:$0xff]   ;;  %v762_v42 = vld [vmem:[%s1266_s2 + $0x1] ss:$0 sm:$0xff]  ;;  %v1024_v51 = vld [vmem:[#allocation5 + $0x100] sm:$0xff]  }
  0x32   :  { %871 = vmatprep.subr.bf16.mxu0 %v1120_v0  ;;  %891 = vmatprep.subr.bf16.mxu1 %v1120_v0  ;;  %v1023_v50 = vld [vmem:[#allocation5 + $0xf8] sm:$0xff]   ;;  %v1025_v52 = vld [vmem:[#allocation5 + $0x108] sm:$0xff]   ;;  %v1026_v53 = vld [vmem:[#allocation5 + $0x110] sm:$0xff]  }
  0x33   :  { %v1027_v54 = vld [vmem:[#allocation5 + $0x118] sm:$0xff]   ;;  %v1028_v55 = vld [vmem:[#allocation5 + $0x120] sm:$0xff]   ;;  %v1029_v56 = vld [vmem:[#allocation5 + $0x128] sm:$0xff]  }
  0x34   :  { %v772_v57 = vld [vmem:[%s1266_s2 + $0x2] ss:$0 sm:$0xff]  ;;  %v1030_v1 = vld [vmem:[#allocation5 + $0x130] sm:$0xff]   ;;  %v1032_v3 = vld [vmem:[#allocation5 + $0x140] sm:$0xff]  }
  0x35   :  { %872 = vmatpush3.bf16.msra.mxu0 %v995_v5  ;;  %892 = vmatpush3.bf16.msra.mxu1 %v1003_v10  ;;  %v1031_v2 = vld [vmem:[#allocation5 + $0x138] sm:$0xff]   ;;  %v1033_v4 = vld [vmem:[#allocation5 + $0x148] sm:$0xff]   ;;  %v1034_v5 = vld [vmem:[#allocation5 + $0x150] sm:$0xff]  }
  0x36   :  { %873 = vmatprep.subr.bf16.mxu0 %v1120_v0  ;;  %893 = vmatprep.subr.bf16.mxu1 %v1120_v0  ;;  %v1035_v6 = vld [vmem:[#allocation5 + $0x158] sm:$0xff]   ;;  %v1037_v8 = vld [vmem:[#allocation5 + $0x168] sm:$0xff]  }
  0x39   :  { %874 = vmatpush3.bf16.msra.mxu0 %v996_v7  ;;  %894 = vmatpush3.bf16.msra.mxu1 %v1004_v12  ;;  %v1036_v7 = vld [vmem:[#allocation5 + $0x160] sm:$0xff]  }
  0x3a   :  { %875 = vmatprep.subr.bf16.mxu0 %v1120_v0  ;;  %895 = vmatprep.subr.bf16.mxu1 %v1120_v0 }
  0x3d   :  { %876 = vmatpush3.bf16.msra.mxu0 %v997_v9  ;;  %896 = vmatpush3.bf16.msra.mxu1 %v1005_v15  ;;  %v782_v9 = vld [vmem:[%s1266_s2 + $0x3] ss:$0 sm:$0xff] }
  0x3e   :  { %877 = vmatprep.subr.bf16.mxu0 %v1120_v0  ;;  %897 = vmatprep.subr.bf16.mxu1 %v1120_v0 }
  0x41   :  { %878 = vmatpush3.bf16.msra.mxu0 %v998_v11  ;;  %898 = vmatpush3.bf16.msra.mxu1 %v1006_v17  ;;  %v1038_v17 = vld [vmem:[#allocation5 + $0x170] sm:$0xff]  }
  0x42   :  { %879 = vmatprep.subr.bf16.mxu0 %v1120_v0  ;;  %899 = vmatprep.subr.bf16.mxu1 %v1120_v0 }
  0x45   :  { %880 = vmatpush3.bf16.msra.mxu0 %v999_v13  ;;  %900 = vmatpush3.bf16.msra.mxu1 %v1007_v18  ;;  %v1039_v18 = vld [vmem:[#allocation5 + $0x178] sm:$0xff]  }
  0x46   :  { %905 = vmatprep.subr.bf16.mxu0 %v1120_v0  ;;  %925 = vmatprep.subr.bf16.mxu1 %v1120_v0 }
  0x48   :  { %882 = vmatmul.mubr.bf16.vlgmr.msra.gmra.mrb[0].mxu0 %v43_v16 }
  0x49   :  { %921 = vmatprep.mubr.msk.bf16.mxu0 %vm1121_vm0, %v1120_v0  ;;  %906 = vmatpush3.bf16.msra.mxu0 %v1008_v19  ;;  %v792_v19 = vld [vmem:[%s1266_s2 + $0x4] ss:$0 sm:$0xff] }
  0x4a   :  { %907 = vmatprep.subr.bf16.mxu0 %v1120_v0 }
  0x4d   :  { %908 = vmatpush3.bf16.msra.mxu0 %v1009_v20 }
  0x4e   :  { %909 = vmatprep.subr.bf16.mxu0 %v1120_v0 }
  0x51   :  { %910 = vmatpush3.bf16.msra.mxu0 %v1010_v21 }
  0x52   :  { %911 = vmatprep.subr.bf16.mxu0 %v1120_v0 }
  0x55   :  { %912 = vmatpush3.bf16.msra.mxu0 %v1011_v22 }
  0x56   :  { %913 = vmatprep.subr.bf16.mxu0 %v1120_v0 }
  0x59   :  { %914 = vmatpush3.bf16.msra.mxu0 %v1012_v23 }
  0x5a   :  { %915 = vmatprep.subr.bf16.mxu0 %v1120_v0 }
  0x5d   :  { %916 = vmatpush3.bf16.msra.mxu0 %v1013_v24 }
  0x5e   :  { %917 = vmatprep.subr.bf16.mxu0 %v1120_v0 }
  0x61   :  { %918 = vmatpush3.bf16.msra.mxu0 %v1014_v33 }
  0x62   :  { %919 = vmatprep.subr.bf16.mxu0 %v1120_v0 }
  0x65   :  { %920 = vmatpush3.bf16.msra.mxu0 %v1015_v34 }
  0x66   :  { %945 = vmatprep.subr.bf16.mxu0 %v1120_v0 }
 0x11b   :  { %v149_v26 = vpop.f32.mrb[0].mxu0 }
 0x11c   :  { %v150_v27 = vadd.f32 %v752_v25, %v149_v26  ;;  %v883_v28 = vpop.f32.mrb[1].mxu0 }
 0x11d   :  { %v152_v29 = vpop.f32.mrb[2].mxu0 }
 0x11e   :  { %v155_v30 = vmax.f32 %v150_v27, 0.0  ;;  %v884_v31 = vpop.f32.mrb[3].mxu0  ;;  %v802_v27 = vld [vmem:[%s1266_s2 + $0x5] ss:$0 sm:$0xff] }
 0x120   :  { %v156_v32 = vpack.c.bf16 %v155_v30, %v155_v30 }
 0x122   :  { %902 = vmatmul.mubr.bf16.vlgmr.msra.gmra.mrb[0].mxu1 %v156_v32 }
 0x123   :  { %941 = vmatprep.mubr.msk.bf16.mxu1 %vm1121_vm0, %v1120_v0  ;;  %926 = vmatpush3.bf16.msra.mxu1 %v1016_v35 }
 0x124   :  { %927 = vmatprep.subr.bf16.mxu1 %v1120_v0 }
 0x127   :  { %928 = vmatpush3.bf16.msra.mxu1 %v1017_v36 }
 0x128   :  { %929 = vmatprep.subr.bf16.mxu1 %v1120_v0 }
 0x12b   :  { %930 = vmatpush3.bf16.msra.mxu1 %v1018_v37 }
 0x12c   :  { %931 = vmatprep.subr.bf16.mxu1 %v1120_v0 }
 0x12f   :  { %932 = vmatpush3.bf16.msra.mxu1 %v1019_v38 }
 0x130   :  { %933 = vmatprep.subr.bf16.mxu1 %v1120_v0 }
 0x133   :  { %934 = vmatpush3.bf16.msra.mxu1 %v1020_v39 }
 0x134   :  { %935 = vmatprep.subr.bf16.mxu1 %v1120_v0 }
 0x137   :  { %936 = vmatpush3.bf16.msra.mxu1 %v1021_v40 }
 0x138   :  { %937 = vmatprep.subr.bf16.mxu1 %v1120_v0 }
 0x13b   :  { %938 = vmatpush3.bf16.msra.mxu1 %v1022_v41 }
 0x13c   :  { %939 = vmatprep.subr.bf16.mxu1 %v1120_v0 }
 0x13f   :  { %940 = vmatpush3.bf16.msra.mxu1 %v1023_v50 }
 0x140   :  { %965 = vmatprep.subr.bf16.mxu1 %v1120_v0 }
 0x1f5   :  { %v264_v43 = vpop.f32.mrb[0].mxu1 }
 0x1f6   :  { %v265_v44 = vadd.f32 %v762_v42, %v264_v43  ;;  %v903_v45 = vpop.f32.mrb[1].mxu1 }
 0x1f7   :  { %v267_v46 = vpop.f32.mrb[2].mxu1 }
 0x1f8   :  { %v270_v47 = vmax.f32 %v265_v44, 0.0  ;;  %v904_v48 = vpop.f32.mrb[3].mxu1 }
 0x1fa   :  { %v271_v49 = vpack.c.bf16 %v270_v47, %v270_v47 }
 0x1fc   :  { %922 = vmatmul.mubr.bf16.vlgmr.msra.gmra.mrb[4].mxu0 %v271_v49 }
 0x1fd   :  { %961 = vmatprep.mubr.msk.bf16.mxu0 %vm1121_vm0, %v1120_v0  ;;  %946 = vmatpush3.bf16.msra.mxu0 %v1024_v51 }
 0x1fe   :  { %947 = vmatprep.subr.bf16.mxu0 %v1120_v0 }
 0x201   :  { %948 = vmatpush3.bf16.msra.mxu0 %v1025_v52 }
 0x202   :  { %949 = vmatprep.subr.bf16.mxu0 %v1120_v0 }
 0x205   :  { %950 = vmatpush3.bf16.msra.mxu0 %v1026_v53 }
 0x206   :  { %951 = vmatprep.subr.bf16.mxu0 %v1120_v0 }
 0x209   :  { %952 = vmatpush3.bf16.msra.mxu0 %v1027_v54 }
 0x20a   :  { %953 = vmatprep.subr.bf16.mxu0 %v1120_v0 }
 0x20d   :  { %954 = vmatpush3.bf16.msra.mxu0 %v1028_v55 }
 0x20e   :  { %955 = vmatprep.subr.bf16.mxu0 %v1120_v0 }
 0x211   :  { %956 = vmatpush3.bf16.msra.mxu0 %v1029_v56 }
 0x212   :  { %957 = vmatprep.subr.bf16.mxu0 %v1120_v0 }
 0x215   :  { %958 = vmatpush3.bf16.msra.mxu0 %v1030_v1 }
 0x216   :  { %959 = vmatprep.subr.bf16.mxu0 %v1120_v0 }
 0x219   :  { %960 = vmatpush3.bf16.msra.mxu0 %v1031_v2 }
 0x2cf   :  { %v379_v58 = vpop.f32.mrb[4].mxu0 }
 0x2d0   :  { %v380_v59 = vadd.f32 %v772_v57, %v379_v58  ;;  %v923_v60 = vpop.f32.mrb[5].mxu0 }
 0x2d1   :  { %v382_v61 = vpop.f32.mrb[6].mxu0 }
 0x2d2   :  { %v385_v62 = vpack.c.bf16 %v380_v59, %v380_v59  ;;  %v924_v63 = vpop.f32.mrb[7].mxu0 }
 0x2d4   :  { %942 = vmatmul.mubr.bf16.vlgmr.msra.gmra.mrb[4].mxu1 %v385_v62 }
 0x2d5   :  { %981 = vmatprep.mubr.msk.bf16.mxu1 %vm1121_vm0, %v1120_v0  ;;  %966 = vmatpush3.bf16.msra.mxu1 %v1032_v3 }
 0x2d6   :  { %967 = vmatprep.subr.bf16.mxu1 %v1120_v0 }
 0x2d9   :  { %968 = vmatpush3.bf16.msra.mxu1 %v1033_v4 }
 0x2da   :  { %969 = vmatprep.subr.bf16.mxu1 %v1120_v0 }
 0x2dd   :  { %970 = vmatpush3.bf16.msra.mxu1 %v1034_v5 }
 0x2de   :  { %971 = vmatprep.subr.bf16.mxu1 %v1120_v0 }
 0x2e1   :  { %972 = vmatpush3.bf16.msra.mxu1 %v1035_v6 }
 0x2e2   :  { %973 = vmatprep.subr.bf16.mxu1 %v1120_v0 }
 0x2e5   :  { %974 = vmatpush3.bf16.msra.mxu1 %v1036_v7 }
 0x2e6   :  { %975 = vmatprep.subr.bf16.mxu1 %v1120_v0 }
 0x2e9   :  { %976 = vmatpush3.bf16.msra.mxu1 %v1037_v8 }
 0x2ea   :  { %977 = vmatprep.subr.bf16.mxu1 %v1120_v0 }
 0x2ed   :  { %978 = vmatpush3.bf16.msra.mxu1 %v1038_v17 }
 0x2ee   :  { %979 = vmatprep.subr.bf16.mxu1 %v1120_v0 }
 0x2f1   :  { %980 = vmatpush3.bf16.msra.mxu1 %v1039_v18 }
 0x3a7   :  { %v493_v10 = vpop.f32.mrb[4].mxu1 }
 0x3a8   :  { %v494_v11 = vadd.f32 %v782_v9, %v493_v10  ;;  %v943_v12 = vpop.f32.mrb[5].mxu1 }
 0x3a9   :  { %v496_v13 = vpop.f32.mrb[6].mxu1 }
 0x3aa   :  { %v499_v14 = vmax.f32 %v494_v11, 0.0  ;;  %v944_v15 = vpop.f32.mrb[7].mxu1 }
 0x3ac   :  { %v500_v16 = vpack.c.bf16 %v499_v14, %v499_v14 }
 0x3ae   :  { %962 = vmatmul.mubr.bf16.vlgmr.msra.gmra.mrb[8].mxu0 %v500_v16 }
 0x481   :  { %v608_v20 = vpop.f32.mrb[8].mxu0 }
 0x482   :  { %v609_v21 = vadd.f32 %v792_v19, %v608_v20  ;;  %v963_v22 = vpop.f32.mrb[9].mxu0 }
 0x483   :  { %v611_v23 = vpop.f32.mrb[10].mxu0 }
 0x484   :  { %v614_v24 = vmax.f32 %v609_v21, 0.0  ;;  %v964_v25 = vpop.f32.mrb[11].mxu0 }
 0x486   :  { %v615_v26 = vpack.c.bf16 %v614_v24, %v614_v24 }
 0x488   :  { %982 = vmatmul.mubr.bf16.vlgmr.msra.gmra.mrb[8].mxu1 %v615_v26 }
 0x55b   :  { %v723_v28 = vpop.f32.mrb[8].mxu1 }
 0x55c   :  { %v724_v0 = vadd.f32 %v802_v27, %v723_v28  ;;  %v983_v29 = vpop.f32.mrb[9].mxu1 }
 0x55d   :  { %v726_v30 = vpop.f32.mrb[10].mxu1 }
 0x55e   :  { %v729_v31 = vsub.f32 0.0, %v724_v0  ;;  %v984_v32 = vpop.f32.mrb[11].mxu1 }
 0x560   :  { %v730_v33 = vmul.f32 1.442695, %v729_v31 }
 0x562   :  { %1040 = vpow2.f32 %v730_v33 }
 0x56c   :  { %v1041_v34 = vpop.eup %1040 }
 0x56d   :  { %v732_v35 = vadd.f32 1.0, %v1041_v34 }
 0x56f   :  { %1042 = vrcp.f32 %v732_v35 }
 0x579   :  { %v1043_v36 = vpop.eup %1042 }
 0x57a   :  { %v734_v37 = vpack.c.bf16 %v1043_v36, %v1043_v36 }
 0x57c   :  { %735 = vst [vmem:[#allocation7] sm:$0xf] %v734_v37 }
 0x57d   :  { %1099 = shalt.err (!%p1096_p6)
}
 0x57e   :  { %s1100_s25 = scalar_lea.hbm %s1267_s3, 64 }
 0x57f   :  { %p1101_p7 = scmp.ne.s32.totalorder %s1267_s3, %s1100_s25  ;;  %p1104_p8 = scmp.lt.u32.totalorder %s1100_s25, %s1267_s3 }
 0x581   :  { %p1106_p9 = pnand %p1104_p8, %p1101_p7 }
 0x583   :  { %1109 = shalt.err (!%p1106_p9)
}
 0x584   :  { %745 = dma.vmem_to_hbm [thread:$0]  %s743_s22, 64, %s1267_s3, [#allocation4]  }
 0x585   :  { %1114 = dma.done.wait [#allocation4], 64  }
 0x586   :  { %1115 = vsyncadd [#allocation4], 4294967232 }
 0x587   :  { %749 = vsyncpa [#allocation3], 1 }
 0x588   :  { %750 = vsyncpa [#allocation6], 1 }
 0x589   :  { %751 = vsyncpa [#allocation4], 1 }

</bundles_post_ra>
